<compile_context>
chip_gen: v6e
topology: v6e:2x2x1
jax: 0.10.0
libtpu: 0.0.40
codegen_flags: <defaults>
</compile_context>

<pallas_src>
import functools

import jax
import jax.numpy as jnp
from jax.experimental import pallas as pl
from jax.experimental.pallas import tpu as pltpu

EPS = 1e-5


def _budgets():
    """Generation-aware VMEM budgets (v5e/v6e: 128 MiB, v7x: 64 MiB)."""
    phys = 64 * 1024 * 1024                      # conservative default (v7x)
    try:
        info = pltpu.get_tpu_info()
        cap = int(getattr(info, "vmem_capacity_bytes", 0) or 0)
        if cap > 0:
            phys = cap
    except Exception:
        pass
    vmem_limit = min((3 * phys) // 4, 96 * 1024 * 1024)   # 48 MiB v7x / 96 MiB v5e,v6e
    tile_target = max(2 * 1024 * 1024, min(phys // 16, 8 * 1024 * 1024))
    fused_max = vmem_limit // 6                  # ~8 MiB v7x / ~16 MiB v5e,v6e
    return vmem_limit, tile_target, fused_max


_VMEM_LIMIT, _TILE_TARGET, _FUSED_MAX = _budgets()


# ----------------------------- kernels ------------------------------------ #

def _bn_fused_kernel(x_ref, w_ref, b_ref, o_ref):
    """BatchNorm1d with the whole (N, C, L) array resident in one VMEM block."""
    x = x_ref[...].astype(jnp.float32)                            # (N, C, L)
    mean = jnp.mean(x, axis=(0, 2), keepdims=True)                # (1, C, 1)
    var = jnp.mean((x - mean) ** 2, axis=(0, 2), keepdims=True)   # biased var
    inv = jax.lax.rsqrt(var + EPS)
    scale = inv * w_ref[...]                                      # (1, C, 1)
    shift = b_ref[...] - mean * scale
    o_ref[...] = (x * scale + shift).astype(o_ref.dtype)          # VPU broadcast


def _bn_stats_kernel(x_ref, sum_ref, sq_ref, *, n_rows, n_cols, inner_steps,
                     need_row_mask, need_col_mask):
    """Per-channel sum / sum-of-squares partials.

    grid = (P, row-blocks-per-core, L-blocks).  Axis 0 is "parallel" so each
    v7x TensorCore owns its own (8, C) partial-accumulator block; row 0 holds
    the running sums, rows 1..7 stay zero so the epilogue can sum all rows.
    """
    p = pl.program_id(0)
    i = pl.program_id(1)
    j = pl.program_id(2)

    @pl.when(jnp.logical_and(i == 0, j == 0))
    def _init():
        sum_ref[...] = jnp.zeros_like(sum_ref)
        sq_ref[...] = jnp.zeros_like(sq_ref)

    x = x_ref[...].astype(jnp.float32)                            # (tn, C, tl)
    tn = x.shape[0]
    tl = x.shape[2]

    if need_col_mask:                                             # ragged L tile
        cols = j * tl + jax.lax.broadcasted_iota(jnp.int32, x.shape, 2)
        x = jnp.where(cols < n_cols, x, 0.0)

    s = jnp.sum(x, axis=2)                                        # (tn, C)
    s2 = jnp.sum(x * x, axis=2)                                   # (tn, C)

    if need_row_mask:                                             # ragged N tile
        rows = (p * inner_steps + i) * tn + jax.lax.broadcasted_iota(
            jnp.int32, s.shape, 0)
        rmask = rows < n_rows
        s = jnp.where(rmask, s, 0.0)
        s2 = jnp.where(rmask, s2, 0.0)

    sum_ref[0:1, :] += jnp.sum(s, axis=0, keepdims=True)          # (1, C)
    sq_ref[0:1, :] += jnp.sum(s2, axis=0, keepdims=True)


def _bn_apply_kernel(x_ref, scale_ref, shift_ref, o_ref):
    """y = x * scale + shift; scale/shift are per-channel ((1,C,1) or (1,C*L))
    and broadcast on the VPU -- one FMA per element."""
    x = x_ref[...].astype(jnp.float32)
    o_ref[...] = (x * scale_ref[...] + shift_ref[...]).astype(o_ref.dtype)


def _in_kernel(x_ref, o_ref):
    """InstanceNorm1d on a tile of rows: normalize each row over L."""
    x = x_ref[...].astype(jnp.float32)                            # (TR, L)
    mean = jnp.mean(x, axis=1, keepdims=True)
    var = jnp.mean((x - mean) ** 2, axis=1, keepdims=True)        # biased var
    o_ref[...] = ((x - mean) * jax.lax.rsqrt(var + EPS)).astype(o_ref.dtype)


# ----------------------------- wrappers ------------------------------------ #

def _batch_norm(x, weight, bias):
    N, C, L = x.shape
    w = jnp.ones((C,), jnp.float32) if weight is None else weight.astype(jnp.float32)
    b = jnp.zeros((C,), jnp.float32) if bias is None else bias.astype(jnp.float32)
    out_shape = jax.ShapeDtypeStruct((N, C, L), x.dtype)
    f32_bytes = N * C * L * 4

    # ---- small/medium: fused single-block kernel (one HBM read of x) ------ #
    if f32_bytes <= _FUSED_MAX:
        full = pl.BlockSpec((N, C, L), lambda: (0, 0, 0))
        prm = pl.BlockSpec((1, C, 1), lambda: (0, 0, 0))
        return pl.pallas_call(
            _bn_fused_kernel,
            out_shape=out_shape,
            in_specs=[full, prm, prm],
            out_specs=full,
            compiler_params=pltpu.CompilerParams(vmem_limit_bytes=_VMEM_LIMIT),
        )(x, w.reshape(1, C, 1), b.reshape(1, C, 1))

    # ---- large: single-pass stats (both TCs) + tiny epilogue + apply ------ #
    # L tiling: keep whole L when a (*, C, L) f32 slice fits the tile budget,
    # otherwise split L in multiples of 128 lanes.
    if C * L * 4 <= _TILE_TARGET:
        tl = L
    else:
        tl = min(L, max(128, (_TILE_TARGET // (C * 4)) // 128 * 128))
    l_steps = pl.cdiv(L, tl)
    tn = min(N, max(1, _TILE_TARGET // (C * tl * 4)))
    nb_total = pl.cdiv(N, tn)
    P = 2 if nb_total >= 2 else 1            # v7x: split row blocks over 2 TCs
    n_steps = pl.cdiv(nb_total, P)
    need_row_mask = (P * n_steps * tn != N)
    need_col_mask = (l_steps * tl != L)

    def x_stats_map(p, i, j):
        # Clamp a possible overhanging block of the second core onto the last
        # valid block; its rows are then fully masked inside the kernel.
        return (jnp.minimum(p * n_steps + i, nb_total - 1), 0, j)

    part_spec = pl.BlockSpec((8, C), lambda p, i, j: (p, 0))
    sums, sqs = pl.pallas_call(
        functools.partial(_bn_stats_kernel, n_rows=N, n_cols=L,
                          inner_steps=n_steps,
                          need_row_mask=need_row_mask,
                          need_col_mask=need_col_mask),
        out_shape=(jax.ShapeDtypeStruct((P * 8, C), jnp.float32),
                   jax.ShapeDtypeStruct((P * 8, C), jnp.float32)),
        grid=(P, n_steps, l_steps),
        in_specs=[pl.BlockSpec((tn, C, tl), x_stats_map)],
        out_specs=(part_spec, part_spec),
        compiler_params=pltpu.CompilerParams(
            dimension_semantics=("parallel", "arbitrary", "arbitrary"),
            vmem_limit_bytes=_VMEM_LIMIT),
    )(x)

    # C-sized epilogue: combine partials, fold the affine into scale/shift.
    cnt = float(N) * float(L)
    mean = jnp.sum(sums, axis=0) / cnt                            # (C,)
    # TODO(synk): single-pass E[x^2]-mean^2 can cancel catastrophically when
    #             |mean| >> std; a shifted / Welford combine would be safer.
    var = jnp.maximum(jnp.sum(sqs, axis=0) / cnt - mean * mean, 0.0)
    inv = jax.lax.rsqrt(var + EPS)
    scale = inv * w                                               # (C,)
    shift = b - mean * scale

    # Apply pass.  When L is not lane-aligned stream a lane-dense (N, C*L)
    # view (unmasked vst); otherwise 3-D blocks reusing the stats tiling.
    row2_bytes = C * L * 4
    use_2d = (L % 128 != 0) and (min(N, 8) * row2_bytes * 6 <= _VMEM_LIMIT)
    if use_2d:
        tn2 = min(N, max(8, (_TILE_TARGET // row2_bytes) // 8 * 8))
        scale2 = jnp.broadcast_to(scale[:, None], (C, L)).reshape(1, C * L)
        shift2 = jnp.broadcast_to(shift[:, None], (C, L)).reshape(1, C * L)
        x2_spec = pl.BlockSpec((tn2, C * L), lambda i: (i, 0))
        prm2 = pl.BlockSpec((1, C * L), lambda i: (0, 0))
        out2 = pl.pallas_call(
            _bn_apply_kernel,
            out_shape=jax.ShapeDtypeStruct((N, C * L), x.dtype),
            grid=(pl.cdiv(N, tn2),),
            in_specs=[x2_spec, prm2, prm2],
            out_specs=x2_spec,
            compiler_params=pltpu.CompilerParams(
                dimension_semantics=("parallel",),
                vmem_limit_bytes=_VMEM_LIMIT),
        )(x.reshape(N, C * L), scale2, shift2)
        return out2.reshape(N, C, L)

    x3_spec = pl.BlockSpec((tn, C, tl), lambda i, j: (i, 0, j))
    prm3 = pl.BlockSpec((1, C, 1), lambda i, j: (0, 0, 0))
    return pl.pallas_call(
        _bn_apply_kernel,
        out_shape=out_shape,
        grid=(nb_total, l_steps),
        in_specs=[x3_spec, prm3, prm3],
        out_specs=x3_spec,
        compiler_params=pltpu.CompilerParams(
            dimension_semantics=("parallel", "parallel"),
            vmem_limit_bytes=_VMEM_LIMIT),
    )(x, scale.reshape(1, C, 1), shift.reshape(1, C, 1))


def _instance_norm(x):
    N, C, L = x.shape
    R = N * C
    xr = x.reshape(R, L)                         # free reshape (contiguous)
    itemsize = x.dtype.itemsize
    pack = 8 * max(1, 4 // itemsize)             # packed-sublane granule 8/16/32
    row_bytes = L * itemsize
    if R * row_bytes <= _TILE_TARGET:
        tr = R
    else:
        tr = min(R, max(pack, (_TILE_TARGET // row_bytes) // pack * pack))
    # TODO(synk): for L < 128 the stores are still lane-masked; a fully
    #             lane-dense repack would need a segmented reduce over rows.
    spec = pl.BlockSpec((tr, L), lambda i: (i, 0))
    out = pl.pallas_call(
        _in_kernel,
        out_shape=jax.ShapeDtypeStruct((R, L), x.dtype),
        grid=(pl.cdiv(R, tr),),
        in_specs=[spec],
        out_specs=spec,
        compiler_params=pltpu.CompilerParams(
            dimension_semantics=("parallel",),
            vmem_limit_bytes=_VMEM_LIMIT),
    )(xr)
    return out.reshape(N, C, L)


def norm1d(x, mode, weight=None, bias=None):
    """Forward pass of Norm1D. x: (N, C, L)."""
    if mode == "batch":
        return _batch_norm(x, weight, bias)
    elif mode == "instance":
        return _instance_norm(x)
    elif mode == "none":
        return x                                 # identity: no kernel launch
    else:
        raise RuntimeError("norm argument has unknown value: " + mode)


# ----------------------------- reference ----------------------------------- #

def _ref_norm1d(x, mode, weight, bias):
    x32 = x.astype(jnp.float32)
    if mode == "batch":
        m = jnp.mean(x32, axis=(0, 2), keepdims=True)
        v = jnp.mean((x32 - m) ** 2, axis=(0, 2), keepdims=True)
        y = (x32 - m) / jnp.sqrt(v + EPS)
        y = y * weight.reshape(1, -1, 1) + bias.reshape(1, -1, 1)
        return y.astype(x.dtype)
    elif mode == "instance":
        m = jnp.mean(x32, axis=2, keepdims=True)
        v = jnp.mean((x32 - m) ** 2, axis=2, keepdims=True)
        return ((x32 - m) / jnp.sqrt(v + EPS)).astype(x.dtype)
    return x


# ------------------------------- main -------------------------------------- #

if __name__ == "__main__":
    key = jax.random.PRNGKey(0)
    ok = True

    # Small shape consistent with the module, plus shapes exercising the fused
    # path, the tiled path with ragged row blocks + lane-dense 2-D apply
    # (L % 128 != 0), and the tiled path with an L split + 3-D apply.
    shapes = [(2, 4, 16), (64, 32, 512), (53, 24, 4000), (2, 64, 40000)]
    for (N, C, L) in shapes:
        key, kx, kw, kb = jax.random.split(key, 4)
        x = jax.random.normal(kx, (N, C, L), dtype=jnp.float32)
        weight = 1.0 + 0.5 * jax.random.normal(kw, (C,), dtype=jnp.float32)
        bias = 0.1 * jax.random.normal(kb, (C,), dtype=jnp.float32)
        for mode in ("batch", "instance", "none"):
            out = jax.block_until_ready(norm1d(x, mode, weight, bias))
            ref = _ref_norm1d(x, mode, weight, bias)
            good = (out.shape == ref.shape
                    and bool(jnp.allclose(out, ref, atol=2e-3, rtol=2e-3)))
            if not good:
                ok = False
                err = float(jnp.max(jnp.abs(out.astype(jnp.float32)
                                            - ref.astype(jnp.float32))))
                print(f"shape={(N, C, L)} mode={mode}: MISMATCH "
                      f"max_abs_err={err}")

    if ok:
        print("KERNEL_OK")
</pallas_src>

<mosaic_0001>
module attributes {stable_mosaic.version = 11 : i64} {
  func.func @_bn_fused_kernel(%arg0: memref<2x4x16xf32, #tpu.memory_space<vmem>>, %arg1: memref<1x4x1xf32, #tpu.memory_space<vmem>>, %arg2: memref<1x4x1xf32, #tpu.memory_space<vmem>>, %arg3: memref<2x4x16xf32, #tpu.memory_space<vmem>>) attributes {dimension_semantics = [], scalar_prefetch = 0 : i64, scratch_operands = 0 : i64, tpu.core_type = #tpu.core_type<tc>} {
    %c0 = arith.constant 0 : index
    %c0_0 = arith.constant 0 : index
    %c0_1 = arith.constant 0 : index
    %0 = vector.load %arg0[%c0, %c0_0, %c0_1] : memref<2x4x16xf32, #tpu.memory_space<vmem>>, vector<2x4x16xf32>
    %cst = arith.constant dense<0.000000e+00> : vector<4xf32>
    %1 = vector.multi_reduction <add>, %0, %cst [0, 2] : vector<2x4x16xf32> to vector<4xf32>
    %2 = vector.shape_cast %1 : vector<4xf32> to vector<1x4x1xf32>
    %cst_2 = arith.constant 3.200000e+01 : f32
    %3 = vector.broadcast %cst_2 : f32 to vector<1x4x1xf32>
    %4 = arith.divf %2, %3 : vector<1x4x1xf32>
    %5 = vector.broadcast %4 : vector<1x4x1xf32> to vector<2x4x16xf32>
    %6 = arith.subf %0, %5 : vector<2x4x16xf32>
    %7 = arith.mulf %6, %6 : vector<2x4x16xf32>
    %cst_3 = arith.constant dense<0.000000e+00> : vector<4xf32>
    %8 = vector.multi_reduction <add>, %7, %cst_3 [0, 2] : vector<2x4x16xf32> to vector<4xf32>
    %9 = vector.shape_cast %8 : vector<4xf32> to vector<1x4x1xf32>
    %cst_4 = arith.constant 3.200000e+01 : f32
    %10 = vector.broadcast %cst_4 : f32 to vector<1x4x1xf32>
    %11 = arith.divf %9, %10 : vector<1x4x1xf32>
    %cst_5 = arith.constant 9.99999974E-6 : f32
    %12 = vector.broadcast %cst_5 : f32 to vector<1x4x1xf32>
    %13 = arith.addf %11, %12 : vector<1x4x1xf32>
    %14 = math.rsqrt %13 : vector<1x4x1xf32>
    %c0_6 = arith.constant 0 : index
    %c0_7 = arith.constant 0 : index
    %c0_8 = arith.constant 0 : index
    %15 = vector.load %arg1[%c0_6, %c0_7, %c0_8] : memref<1x4x1xf32, #tpu.memory_space<vmem>>, vector<1x4x1xf32>
    %16 = arith.mulf %14, %15 : vector<1x4x1xf32>
    %c0_9 = arith.constant 0 : index
    %c0_10 = arith.constant 0 : index
    %c0_11 = arith.constant 0 : index
    %17 = vector.load %arg2[%c0_9, %c0_10, %c0_11] : memref<1x4x1xf32, #tpu.memory_space<vmem>>, vector<1x4x1xf32>
    %18 = arith.mulf %4, %16 : vector<1x4x1xf32>
    %19 = arith.subf %17, %18 : vector<1x4x1xf32>
    %20 = vector.broadcast %16 : vector<1x4x1xf32> to vector<2x4x16xf32>
    %21 = arith.mulf %0, %20 : vector<2x4x16xf32>
    %22 = vector.broadcast %19 : vector<1x4x1xf32> to vector<2x4x16xf32>
    %23 = arith.addf %21, %22 : vector<2x4x16xf32>
    %c0_12 = arith.constant 0 : index
    %c0_13 = arith.constant 0 : index
    %c0_14 = arith.constant 0 : index
    %24 = vector.load %arg3[%c0_12, %c0_13, %c0_14] : memref<2x4x16xf32, #tpu.memory_space<vmem>>, vector<2x4x16xf32>
    tpu.vector_store %arg3[%c0_12, %c0_13, %c0_14], %23 {strides = array<i32>} : memref<2x4x16xf32, #tpu.memory_space<vmem>>, vector<2x4x16xf32>,
    return
  }
}

</mosaic_0001>

<bundles_post_ra>
// kernel: tpu_custom_call.1
= control target key start
LH: loop header
LB: loop body
LE: loop exit
PB: predicated region body
PF: predicated region fallthrough
CT: control target
= control target key end

     0   :  { %vm17_vm0 = vcmask 125952   ;;  %s149_s0 = inlined_call_operand.vmem [shape: f32[2,4,16], index: 0, kind: input, shape index: {}]   ;;  %s150_s1 = inlined_call_operand.vmem [shape: f32[1,4,1], index: 1, kind: input, shape index: {}]   ;;  %s151_s2 = inlined_call_operand.vmem [shape: f32[1,4,1], index: 2, kind: input, shape index: {}]   ;;  %s152_s3 = inlined_call_operand.hbm [shape: f32[2,4,16], index: 3, kind: output, shape index: {}]  }
   0x1   :  { %v15_v0 = vld [vmem:[%s149_s0] sm:$0xf]  ;;  %v16_v1 = vld [vmem:[%s149_s0 + $0x4] sm:$0xf] }
   0x2   :  { %v18_v2 = vsel %vm17_vm0, %v15_v0, 0.0  ;;  %v19_v3 = vsel %vm17_vm0, %v16_v1, 0.0 }
   0x3   :  { %8 = vsyncpa [#allocation3], 0  ;;  %v20_v4 = vadd.f32 %v19_v3, %v18_v2  ;;  %v104_v14 = vmov 0   ;;  %v37_v18 = vld [vmem:[%s150_s1] sm:$0xf]  ;;  %s105_s19 = smov [#allocation2]  }
   0x4   :  { %78 = vset.pattern.permute.xlu1 %v104_v14  ;;  %79 = vset.pattern.permute.xlu0 %v104_v14  ;;  %v39_v21 = vld [vmem:[%s151_s2] sm:$0xf]  ;;  %s63_s20 = sshll.u32 %s105_s19, 4  ;;  %s64_s20 = int_to_ptr.vmem [resolvable:$true] %s63_s20 }
   0x5   :  { %21 = vadd.xlane.f32.xlu0 %v20_v4  ;;  %s82_s1 = scalar_lea.vmem %s64_s20, 128  ;;  %p87_p1 = scmp.lt.s32.totalorder %s64_s20, %s64_s20 }
   0x6   :  { %p83_p0 = scmp.ne.s32.totalorder %s64_s20, %s82_s1  ;;  %p88_p2 = scmp.lt.s32.totalorder %s82_s1, %s82_s1 }
   0x8   :  { %p89_p3 = por %p88_p2, %p87_p1 }
   0xa   :  { %p90_p4 = pnand %p89_p3, %p83_p0 }
  0x8e   :  { %v22_v5 = vpop.xlane.xlu0 %21 }
  0x8f   :  { %v24_v6 = vmul.f32 0.03125, %v22_v5 }
  0x91   :  { %v25_v7 = vsub.f32 %v15_v0, %v24_v6  ;;  %v26_v8 = vsub.f32 %v16_v1, %v24_v6 }
  0x93   :  { %v27_v9 = vmul.f32 %v25_v7, %v25_v7  ;;  %v28_v10 = vmul.f32 %v26_v8, %v26_v8 }
  0x95   :  { %v29_v11 = vsel %vm17_vm0, %v27_v9, 0.0  ;;  %v30_v12 = vsel %vm17_vm0, %v28_v10, 0.0 }
  0x96   :  { %v31_v13 = vadd.f32 %v30_v12, %v29_v11 }
  0x98   :  { %32 = vadd.xlane.f32.xlu0 %v31_v13 }
 0x121   :  { %v33_v15 = vpop.xlane.xlu0 %32 }
 0x122   :  { %v34_v16 = vmul.f32 0.03125, %v33_v15 }
 0x124   :  { %v35_v17 = vadd.f32 1e-05, %v34_v16 }
 0x126   :  { %80 = vrsqrt.f32 %v35_v17 }
 0x133   :  { %v81_v19 = vpop.eup %80 }
 0x134   :  { %v38_v20 = vmul.f32 %v81_v19, %v37_v18 }
 0x136   :  { %44 = vperm.xlu1 %78, %v38_v20   ;;  %v40_v22 = vmul.f32 %v38_v20, %v24_v6 }
 0x138   :  { %v41_v23 = vsub.f32 %v39_v21, %v40_v22 }
 0x13a   :  { %51 = vperm.xlu1 %78, %v41_v23  }
 0x1b1   :  { %v45_v24 = vpop.permute.xlu1 %44 }
 0x1b2   :  { %v47_v25 = vmul.f32 %v45_v24, %v15_v0  ;;  %v48_v26 = vmul.f32 %v45_v24, %v16_v1 }
 0x1b5   :  { %v52_v27 = vpop.permute.xlu1 %51 }
 0x1b6   :  { %v54_v28 = vadd.f32 %v52_v27, %v47_v25  ;;  %v55_v29 = vadd.f32 %v52_v27, %v48_v26 }
 0x1b8   :  { %56 = vst.msk [vmem:[#allocation2] sm:$0xf] %vm17_vm0, %v54_v28  ;;  %57 = vst.msk [vmem:[#allocation2 + $0x4] sm:$0xf] %vm17_vm0, %v55_v29 }
 0x1b9   :  { %93 = shalt.err (!%p90_p4)
}
 0x1ba   :  { %s106_s2 = smov 64   ;;  %s107_s21 = smov 4  }
 0x1bb   :  { %69 = dma.vmem_to_hbm [thread:$0]  %s64_s20, 128, %s152_s3, [#allocation3], %s106_s2, %s106_s2, %s107_s21  }
 0x1bc   :  { %102 = dma.done.wait [#allocation3], 128  }
 0x1bd   :  { %103 = vsyncadd [#allocation3], 4294967168 }
 0x1be   :  { %73 = vsyncpa [#allocation3], 1 }

</bundles_post_ra>
